<compile_context>
chip_gen: v7x
topology: tpu7x:2x2x1
jax: 0.10.0
libtpu: 0.0.40
codegen_flags: <defaults>
</compile_context>

<pallas_src>
import functools

import jax
import jax.numpy as jnp
from jax.experimental import pallas as pl
from jax.experimental.pallas import tpu as pltpu


def _round_up(x, m):
    return ((x + m - 1) // m) * m


# --------------------- generation-aware VMEM budget --------------------------


def _physical_vmem_bytes():
    try:
        fn = getattr(pltpu, "get_tpu_info", None)
        if fn is None:
            return 64 << 20
        info = fn()
        for name in ("vmem_capacity_bytes", "vmem_bytes", "vmem_size_bytes"):
            v = getattr(info, name, None)
            if v:
                return int(v)
    except Exception:
        pass
    return 64 << 20  # conservative (v7x-safe) fallback


_PHYS_VMEM = _physical_vmem_bytes()

if _PHYS_VMEM <= (64 << 20):
    # v7x-class: 64 MiB VMEM per TensorCore.  Leave headroom for Mosaic's own
    # scratch -> never request the full physical VMEM.
    _TILE_BUDGET = 36 << 20
    _VMEM_LIMIT_CAP = 52 << 20
    _MAX_TK = 2048
    _MAX_TILE = 512
else:
    # v5e/v6e: 128 MiB VMEM -> allow larger resident weights / bigger tiles.
    _TILE_BUDGET = 80 << 20
    _VMEM_LIMIT_CAP = 100 << 20
    _MAX_TK = 4096
    _MAX_TILE = 1024


def _vmem_limit(est_bytes):
    return int(min(_VMEM_LIMIT_CAP, max(32 << 20, est_bytes + (8 << 20))))


# --------------------------- tile planning -----------------------------------


def _pick_tile(x, candidates, waste_tol=0.09):
    """Largest candidate tile whose padded size is within waste_tol of the minimum."""
    base = _round_up(x, min(candidates))
    best = min(candidates)
    for t in sorted(candidates):
        if _round_up(x, t) <= base * (1.0 + waste_tol):
            best = t
    return best


def _tile_candidates():
    return [c for c in (128, 256, 512, 1024) if c <= _MAX_TILE]


def _resident_tn(Mp, Kp, N, itemsize):
    """N-tile for the A-resident kernel, or None if A can't be kept resident."""
    tn = 128 if N <= 128 else _pick_tile(N, _tile_candidates())
    while True:
        ws = (Mp * Kp + 2 * Kp * tn + 2 * Mp * tn) * itemsize + Mp * tn * 4
        if ws <= _TILE_BUDGET:
            return tn
        if tn <= 128:
            return None
        tn = max(128, tn // 2)


def _gramian_tn(Mp, Kp, N, itemsize):
    tn = 128 if N <= 128 else _pick_tile(N, _tile_candidates())
    while tn > 128:
        ws = (2 * Mp * Kp + 4 * Kp * tn) * itemsize + (Mp + Kp) * tn * 4
        if ws <= _TILE_BUDGET:
            break
        tn //= 2
    return tn


def _choose_tiles_streaming(M, N, K, itemsize, max_tk=None):
    max_tk = max_tk or _MAX_TK
    cand = _tile_candidates()
    tm = _round_up(M, 8) if M <= _MAX_TILE else _pick_tile(M, cand)
    tn = 128 if N <= 128 else _pick_tile(N, cand)
    tk = _round_up(K, 128) if K <= max_tk else max_tk

    def ws(tm_, tn_, tk_):
        return (2 * (tm_ * tk_ + tk_ * tn_) + 2 * tm_ * tn_) * itemsize + tm_ * tn_ * 4

    while tk > 512 and ws(tm, tn, tk) > _TILE_BUDGET:
        tk = _round_up(tk // 2, 128)
    while tn > 256 and ws(tm, tn, tk) > _TILE_BUDGET:
        tn //= 2
    while tm > 256 and ws(tm, tn, tk) > _TILE_BUDGET:
        tm = _round_up(tm // 2, 8)
    return tm, tn, tk


# --------------------------- matmul kernels ----------------------------------


def _mm_kernel_resident(a_ref, b_ref, o_ref):
    # A resident in VMEM across the whole grid; one MXU pass per N tile.
    o_ref[...] = jnp.dot(
        a_ref[...], b_ref[...], preferred_element_type=jnp.float32
    ).astype(o_ref.dtype)


def _mm_kernel_noacc(a_ref, b_ref, o_ref):
    o_ref[...] = jnp.dot(
        a_ref[...], b_ref[...], preferred_element_type=jnp.float32
    ).astype(o_ref.dtype)


def _mm_kernel_acc(a_ref, b_ref, o_ref, acc_ref):
    @pl.when(pl.program_id(2) == 0)
    def _():
        acc_ref[...] = jnp.zeros_like(acc_ref)

    acc_ref[...] += jnp.dot(a_ref[...], b_ref[...], preferred_element_type=jnp.float32)

    @pl.when(pl.program_id(2) == pl.num_programs(2) - 1)
    def _():
        o_ref[...] = acc_ref[...].astype(o_ref.dtype)


@functools.partial(jax.jit, static_argnames=("tn",))
def _matmul_resident_padded(a, b, *, tn):
    Mp, Kp = a.shape
    _, Np = b.shape
    out_dtype = jnp.promote_types(a.dtype, b.dtype)
    item = max(a.dtype.itemsize, b.dtype.itemsize)
    est = (Mp * Kp + 2 * Kp * tn + 2 * Mp * tn) * item + Mp * tn * 4
    cost = pl.CostEstimate(
        flops=2 * Mp * Np * Kp,
        transcendentals=0,
        bytes_accessed=(Mp * Kp + Kp * Np + Mp * Np) * item,
    )
    return pl.pallas_call(
        _mm_kernel_resident,
        out_shape=jax.ShapeDtypeStruct((Mp, Np), out_dtype),
        grid_spec=pltpu.PrefetchScalarGridSpec(
            num_scalar_prefetch=0,
            grid=(Np // tn,),
            in_specs=[
                pl.BlockSpec((Mp, Kp), lambda j: (0, 0)),   # A fetched once, stays in VMEM
                pl.BlockSpec((Kp, tn), lambda j: (0, j)),
            ],
            out_specs=pl.BlockSpec((Mp, tn), lambda j: (0, j)),
        ),
        compiler_params=pltpu.CompilerParams(
            dimension_semantics=("parallel",),
            vmem_limit_bytes=_vmem_limit(est),
        ),
        cost_estimate=cost,
    )(a, b)


@functools.partial(jax.jit, static_argnames=("tm", "tn", "tk"))
def _matmul_streaming_padded(a, b, *, tm, tn, tk):
    M, K = a.shape
    _, N = b.shape
    out_dtype = jnp.promote_types(a.dtype, b.dtype)
    item = max(a.dtype.itemsize, b.dtype.itemsize)
    est = (2 * (tm * tk + tk * tn) + 2 * tm * tn) * item + tm * tn * 4
    cost = pl.CostEstimate(
        flops=2 * M * N * K,
        transcendentals=0,
        bytes_accessed=(M * K + K * N + M * N) * item,
    )
    vmem_limit = _vmem_limit(est)
    nk = K // tk

    if nk == 1:
        # Single K tile -> 2-D grid, no accumulator scratch, direct store.
        return pl.pallas_call(
            _mm_kernel_noacc,
            out_shape=jax.ShapeDtypeStruct((M, N), out_dtype),
            grid_spec=pltpu.PrefetchScalarGridSpec(
                num_scalar_prefetch=0,
                grid=(M // tm, N // tn),
                in_specs=[
                    pl.BlockSpec((tm, tk), lambda i, j: (i, 0)),
                    pl.BlockSpec((tk, tn), lambda i, j: (0, j)),
                ],
                out_specs=pl.BlockSpec((tm, tn), lambda i, j: (i, j)),
            ),
            compiler_params=pltpu.CompilerParams(
                dimension_semantics=("parallel", "parallel"),
                vmem_limit_bytes=vmem_limit,
            ),
            cost_estimate=cost,
        )(a, b)

    return pl.pallas_call(
        _mm_kernel_acc,
        out_shape=jax.ShapeDtypeStruct((M, N), out_dtype),
        grid_spec=pltpu.PrefetchScalarGridSpec(
            num_scalar_prefetch=0,
            grid=(M // tm, N // tn, nk),
            in_specs=[
                pl.BlockSpec((tm, tk), lambda i, j, k: (i, k)),
                pl.BlockSpec((tk, tn), lambda i, j, k: (k, j)),
            ],
            out_specs=pl.BlockSpec((tm, tn), lambda i, j, k: (i, j)),
            scratch_shapes=[pltpu.VMEM((tm, tn), jnp.float32)],
        ),
        compiler_params=pltpu.CompilerParams(
            dimension_semantics=("parallel", "parallel", "arbitrary"),
            vmem_limit_bytes=vmem_limit,
        ),
        cost_estimate=cost,
    )(a, b)


# --------------------------- wrappers -----------------------------------------


def _resident_matmul(w_pad, out_rows, x):
    """w_pad: (Mp, Kp) zero-padded weight (VMEM-resident). x: (K, N) with K <= Kp."""
    Mp, Kp = w_pad.shape
    K, N = x.shape
    item = max(w_pad.dtype.itemsize, x.dtype.itemsize)
    tn = _resident_tn(Mp, Kp, N, item)
    assert tn is not None
    Np = _round_up(N, tn)
    if Np // tn == 1 and tn >= 256:
        tn //= 2  # give the 'parallel' axis >= 2 steps so both v7x TCs get work
    xp = jnp.pad(x, ((0, Kp - K), (0, Np - N))) if (Kp, Np) != (K, N) else x
    out = _matmul_resident_padded(w_pad, xp, tn=tn)
    if (Mp, Np) != (out_rows, N):
        out = out[:out_rows, :N]
    return out


def _matmul_streaming(a, b, *, max_tk=None):
    M, K = a.shape
    K2, N = b.shape
    if K != K2:
        raise ValueError(f"inner dims mismatch: {K} vs {K2}")
    item = max(a.dtype.itemsize, b.dtype.itemsize)
    tm, tn, tk = _choose_tiles_streaming(M, N, K, item, max_tk=max_tk)
    Mp, Np, Kp = _round_up(M, tm), _round_up(N, tn), _round_up(K, tk)
    ap = jnp.pad(a, ((0, Mp - M), (0, Kp - K))) if (Mp, Kp) != (M, K) else a
    bp = jnp.pad(b, ((0, Kp - K), (0, Np - N))) if (Kp, Np) != (K, N) else b
    out = _matmul_streaming_padded(ap, bp, tm=tm, tn=tn, tk=tk)
    if (Mp, Np) != (M, N):
        out = out[:M, :N]
    return out


def pallas_matmul(a, b):
    """(M, K) @ (K, N) via Pallas. A-resident fast path when A fits in VMEM."""
    a = jnp.asarray(a)
    b = jnp.asarray(b)
    M, K = a.shape
    K2, N = b.shape
    if K != K2:
        raise ValueError(f"inner dims mismatch: {K} vs {K2}")
    item = max(a.dtype.itemsize, b.dtype.itemsize)
    Mp, Kp = _round_up(M, 128), _round_up(K, 128)
    if _resident_tn(Mp, Kp, N, item) is not None:
        ap = jnp.pad(a, ((0, Mp - M), (0, Kp - K))) if (Mp, Kp) != (M, K) else a
        return _resident_matmul(ap, M, b)
    return _matmul_streaming(a, b)


# --------------------------- fused gramian ------------------------------------


def _gramian_kernel(a_ref, at_ref, x_ref, o_ref):
    # y = A @ x_tile stays on-chip; never written to HBM.
    y = jnp.dot(a_ref[...], x_ref[...], preferred_element_type=jnp.float32)
    # Pre-transposed resident A.T -> second matmul is also canonical MXU form
    # (no per-grid-step in-kernel transpose).  NOTE: with compute_dtype=bf16 the
    # intermediate is rounded to bf16 here, matching the unfused bf16 path.
    g = jnp.dot(at_ref[...], y.astype(at_ref.dtype), preferred_element_type=jnp.float32)
    o_ref[...] = g.astype(o_ref.dtype)


@functools.partial(jax.jit, static_argnames=("tn",))
def _gramian_padded(a, a_t, x, *, tn):
    Mp, Kp = a.shape
    _, Np = x.shape
    out_dtype = jnp.promote_types(a.dtype, x.dtype)
    item = max(a.dtype.itemsize, x.dtype.itemsize)
    est = 2 * Mp * Kp * a.dtype.itemsize + 4 * Kp * tn * item + (Mp + Kp) * tn * 4
    cost = pl.CostEstimate(
        flops=4 * Mp * Kp * Np,
        transcendentals=0,
        bytes_accessed=(2 * Mp * Kp + 2 * Kp * Np) * item,
    )
    return pl.pallas_call(
        _gramian_kernel,
        out_shape=jax.ShapeDtypeStruct((Kp, Np), out_dtype),
        grid_spec=pltpu.PrefetchScalarGridSpec(
            num_scalar_prefetch=0,
            grid=(Np // tn,),
            in_specs=[
                pl.BlockSpec((Mp, Kp), lambda j: (0, 0)),   # A resident
                pl.BlockSpec((Kp, Mp), lambda j: (0, 0)),   # A.T resident
                pl.BlockSpec((Kp, tn), lambda j: (0, j)),
            ],
            out_specs=pl.BlockSpec((Kp, tn), lambda j: (0, j)),
        ),
        compiler_params=pltpu.CompilerParams(
            dimension_semantics=("parallel",),
            vmem_limit_bytes=_vmem_limit(est),
        ),
        cost_estimate=cost,
    )(a, a_t, x)


# --------------------------- operator class -----------------------------------


class Convolution:
    """JAX/Pallas port of the PyTorch `convolution` LinearOperator."""

    def __init__(self, W, trace_length, compute_dtype=None):
        W = jnp.asarray(W)
        if compute_dtype is not None:
            # Optional bf16/fp8 path: unlocks the MXU peak (f32 accumulation kept).
            W = W.astype(compute_dtype)
        self.A = W
        self.A_T = jnp.asarray(W.T)
        self.trace_len = trace_length
        self.compute_dtype = compute_dtype

        M, K = W.shape
        item = W.dtype.itemsize
        Mp, Kp = _round_up(M, 128), _round_up(K, 128)
        self._M, self._K, self._Mp, self._Kp = M, K, Mp, Kp

        # Padded (and cast) copies built ONCE — no per-call pad of the constant weight.
        self._A_pad = jnp.pad(W, ((0, Mp - M), (0, Kp - K))) if (Mp, Kp) != (M, K) else W
        self._AT_pad = (
            jnp.pad(self.A_T, ((0, Kp - K), (0, Mp - M))) if (Mp, Kp) != (M, K) else self.A_T
        )

        # Resident-path eligibility (checked at the tn=128 floor).
        self._resident_fwd_ok = _resident_tn(Mp, Kp, 128, item) is not None
        self._resident_adj_ok = _resident_tn(Kp, Mp, 128, item) is not None
        # Fused gramian gate: FULL working set (both residents + per-step blocks).
        fused_ws = 2 * Mp * Kp * item + 4 * Kp * 128 * item + (Mp + Kp) * 128 * 4
        self._fuse_gramian = fused_ws <= _TILE_BUDGET

    def _cast(self, v):
        v = jnp.asarray(v)
        return v.astype(self.compute_dtype) if self.compute_dtype is not None else v

    def forward(self, x):                 # A @ x
        x = self._cast(x)
        if x.shape[0] != self._K:
            raise ValueError(f"expected {self._K} rows, got {x.shape[0]}")
        if self._resident_fwd_ok:
            return _resident_matmul(self._A_pad, self._M, x)
        return _matmul_streaming(self.A, x)

    def adjoint(self, y):                 # A.T @ y (cached, pre-padded transpose)
        y = self._cast(y)
        if y.shape[0] != self._M:
            raise ValueError(f"expected {self._M} rows, got {y.shape[0]}")
        if self._resident_adj_ok:
            return _resident_matmul(self._AT_pad, self._K, y)
        return _matmul_streaming(self.A_T, y)

    def gramian(self, x):                 # A.T @ A @ x
        x = self._cast(x)
        if x.shape[0] != self._K:
            raise ValueError(f"expected {self._K} rows, got {x.shape[0]}")
        if self._fuse_gramian:
            return self._gramian_fused(x)
        return self.adjoint(self.forward(x))

    def _gramian_fused(self, x):
        Mp, Kp, K = self._Mp, self._Kp, self._K
        _, N = x.shape
        item = max(self._A_pad.dtype.itemsize, x.dtype.itemsize)
        tn = _gramian_tn(Mp, Kp, N, item)
        Np = _round_up(N, tn)
        if Np // tn == 1 and tn >= 256:
            tn //= 2
        xp = jnp.pad(x, ((0, Kp - K), (0, Np - N))) if (Kp, Np) != (K, N) else x
        out = _gramian_padded(self._A_pad, self._AT_pad, xp, tn=tn)
        if (Kp, Np) != (K, N):
            out = out[:K, :N]
        return out


if __name__ == "__main__":
    key = jax.random.PRNGKey(0)
    k_w, k_x = jax.random.split(key)

    # Small synthetic shapes: trace_length = 256, output rows M = 256, N = 128 columns.
    trace_length = 256
    M, K, N = 256, trace_length, 128

    W = jax.random.normal(k_w, (M, K), dtype=jnp.float32)
    x = jax.random.normal(k_x, (K, N), dtype=jnp.float32)

    op = Convolution(W, trace_length)

    # forward (A-resident path)
    y = op.forward(x)
    jax.block_until_ready(y)
    y_ref = W @ x
    assert y.shape == (M, N)
    assert jnp.allclose(y, y_ref, atol=1e-3, rtol=1e-3), "forward mismatch"

    # adjoint (cached pre-padded transpose, A.T-resident path)
    a = op.adjoint(y)
    jax.block_until_ready(a)
    a_ref = W.T @ y_ref
    assert jnp.allclose(a, a_ref, atol=1e-2, rtol=1e-3), "adjoint mismatch"

    # gramian (fused single-kernel path, both A and A.T resident)
    g = op.gramian(x)
    jax.block_until_ready(g)
    g_ref = W.T @ (W @ x)
    assert jnp.allclose(g, g_ref, atol=1e-2, rtol=1e-3), "gramian mismatch"

    # Ragged shapes exercise the padding paths.
    M2, K2, N2 = 200, 300, 96
    W2 = jax.random.normal(k_w, (M2, K2), dtype=jnp.float32)
    x2 = jax.random.normal(k_x, (K2, N2), dtype=jnp.float32)
    op2 = Convolution(W2, K2)
    y2 = op2.forward(x2)
    jax.block_until_ready(y2)
    assert jnp.allclose(y2, W2 @ x2, atol=1e-3, rtol=1e-3), "ragged forward mismatch"
    g2 = op2.gramian(x2)
    jax.block_until_ready(g2)
    assert jnp.allclose(g2, W2.T @ (W2 @ x2), atol=1e-2, rtol=1e-3), "ragged gramian mismatch"

    # Streaming (tiled K-reduction) kernel exercised directly with a forced small tk.
    M3, K3, N3 = 256, 512, 256
    W3 = jax.random.normal(k_w, (M3, K3), dtype=jnp.float32)
    x3 = jax.random.normal(k_x, (K3, N3), dtype=jnp.float32)
    y3 = _matmul_streaming(W3, x3, max_tk=256)   # 2-step K accumulation path
    jax.block_until_ready(y3)
    assert jnp.allclose(y3, W3 @ x3, atol=1e-2, rtol=1e-3), "streaming matmul mismatch"

    print("KERNEL_OK")
</pallas_src>

<mosaic_0001>
module attributes {stable_mosaic.version = 11 : i64} {
  func.func @_mm_kernel_resident(%arg0: i32, %arg1: memref<256x256xf32, #tpu.memory_space<vmem>>, %arg2: memref<256x128xf32, #tpu.memory_space<vmem>>, %arg3: memref<256x128xf32, #tpu.memory_space<vmem>>) attributes {dimension_semantics = [#tpu.dimension_semantics<parallel>], iteration_bounds = array<i64: 1>, scalar_prefetch = 0 : i64, scratch_operands = 0 : i64, tpu.core_type = #tpu.core_type<tc>, window_params = [{pipeline_mode = #tpu.pipeline_mode<synchronous>, transform_indices = @transform_0, window_bounds = array<i64: 256, 256>}, {transform_indices = @transform_1, window_bounds = array<i64: 256, 128>}, {transform_indices = @transform_2, window_bounds = array<i64: 256, 128>}]} {
    %c0 = arith.constant 0 : index
    %c0_0 = arith.constant 0 : index
    %0 = vector.load %arg1[%c0, %c0_0] : memref<256x256xf32, #tpu.memory_space<vmem>>, vector<256x256xf32>
    %c0_1 = arith.constant 0 : index
    %c0_2 = arith.constant 0 : index
    %1 = vector.load %arg2[%c0_1, %c0_2] : memref<256x128xf32, #tpu.memory_space<vmem>>, vector<256x128xf32>
    %cst = arith.constant dense<0.000000e+00> : vector<256x128xf32>
    %2 = tpu.matmul %0, %1, %cst {dimension_numbers = #tpu.dot_dimension_numbers<[1], [0], [0], [1], [0, 0, 1, 1], [], []>} : vector<256x256xf32>, vector<256x128xf32>, vector<256x128xf32> -> vector<256x128xf32>
    %c0_3 = arith.constant 0 : index
    %c0_4 = arith.constant 0 : index
    %3 = vector.load %arg3[%c0_3, %c0_4] : memref<256x128xf32, #tpu.memory_space<vmem>>, vector<256x128xf32>
    tpu.vector_store %arg3[%c0_3, %c0_4], %2 {strides = array<i32>} : memref<256x128xf32, #tpu.memory_space<vmem>>, vector<256x128xf32>,
    return
  }
  func.func @transform_0(%arg0: i32) -> (i32, i32) {
    %c0_i32 = arith.constant 0 : i32
    %c0_i32_0 = arith.constant 0 : i32
    %c0_i32_1 = arith.constant 0 : i32
    return %c0_i32, %c0_i32_0 : i32, i32
  }
  func.func @transform_1(%arg0: i32) -> (i32, i32) {
    %c0_i32 = arith.constant 0 : i32
    %c0_i32_0 = arith.constant 0 : i32
    return %c0_i32, %arg0 : i32, i32
  }
  func.func @transform_2(%arg0: i32) -> (i32, i32) {
    %c0_i32 = arith.constant 0 : i32
    %c0_i32_0 = arith.constant 0 : i32
    return %c0_i32, %arg0 : i32, i32
  }
}

</mosaic_0001>

<bundles_post_ra>
// kernel: _matmul_resident_padded.1
= control target key start
LH: loop header
LB: loop body
LE: loop exit
PB: predicated region body
PF: predicated region fallthrough
CT: control target
= control target key end

     0   :  { %7 = vsyncpa [#allocation3], 0  ;;  %s668_s0 = inlined_call_operand.hbm [shape: f32[256,256], index: 0, kind: input, shape index: {}]   ;;  %s669_s1 = inlined_call_operand.hbm [shape: f32[256,128], index: 1, kind: input, shape index: {}]   ;;  %s670_s2 = inlined_call_operand.hbm [shape: f32[256,128], index: 2, kind: output, shape index: {}]  }
   0x1   :  { %8 = vsyncpa [#allocation6], 0 }
   0x2   :  { %9 = vsyncpa [#allocation4], 0  ;;  %s571_s9 = smov [#allocation2]   ;;  %s499_s13 = scalar_lea.hbm %s668_s0, 8192 }
   0x3   :  { %s15_s10 = sshll.u32 %s571_s9, 4  ;;  %p500_p0 = scmp.ne.s32.totalorder %s668_s0, %s499_s13  ;;  %s16_s10 = int_to_ptr.vmem [resolvable:$true] %s15_s10 }
   0x4   :  { %p503_p1 = scmp.lt.u32.totalorder %s499_s13, %s668_s0 }
   0x6   :  { %p505_p2 = pnand %p503_p1, %p500_p0 }
   0x8   :  { %508 = shalt.err (!%p505_p2)
}
   0x9   :  { %s509_s18 = scalar_lea.vmem %s16_s10, 8192  ;;  %p514_p4 = scmp.lt.s32.totalorder %s16_s10, %s16_s10 }
   0xa   :  { %p510_p3 = scmp.ne.s32.totalorder %s16_s10, %s509_s18  ;;  %p515_p5 = scmp.lt.s32.totalorder %s509_s18, %s509_s18 }
   0xc   :  { %p516_p6 = por %p515_p5, %p514_p4 }
   0xe   :  { %p517_p7 = pnand %p516_p6, %p510_p3 }
  0x10   :  { %520 = shalt.err (!%p517_p7)
}
  0x11   :  { %s572_s19 = smov 256   ;;  %s573_s20 = smov 16  }
  0x12   :  { %21 = dma.hbm_to_vmem [thread:$0]  %s668_s0, 8192, %s16_s10, [#allocation3], %s572_s19, %s572_s19, %s573_s20  }
  0x13   :  { %s574_s23 = smov [#allocation5]   ;;  %s521_s27 = scalar_lea.hbm %s669_s1, 4096 }
  0x14   :  { %s27_s24 = sshll.u32 %s574_s23, 4  ;;  %p522_p8 = scmp.ne.s32.totalorder %s669_s1, %s521_s27  ;;  %s28_s24 = int_to_ptr.vmem [resolvable:$true] %s27_s24 }
  0x15   :  { %p525_p9 = scmp.lt.u32.totalorder %s521_s27, %s669_s1 }
  0x17   :  { %p527_p10 = pnand %p525_p9, %p522_p8 }
  0x19   :  { %530 = shalt.err (!%p527_p10)
}
  0x1a   :  { %s531_s4 = scalar_lea.vmem %s28_s24, 4096  ;;  %p536_p12 = scmp.lt.s32.totalorder %s28_s24, %s28_s24 }
  0x1b   :  { %p532_p11 = scmp.ne.s32.totalorder %s28_s24, %s531_s4  ;;  %p537_p13 = scmp.lt.s32.totalorder %s531_s4, %s531_s4 }
  0x1d   :  { %p538_p0 = por %p537_p13, %p536_p12 }
  0x1f   :  { %p539_p1 = pnand %p538_p0, %p532_p11 }
  0x21   :  { %542 = shalt.err (!%p539_p1)
}
  0x22   :  { %s575_s0 = smov 128   ;;  %s576_s5 = smov 8  }
  0x23   :  { %33 = dma.hbm_to_vmem [thread:$0]  %s669_s1, 4096, %s28_s24, [#allocation6], %s575_s0, %s575_s0, %s576_s5  }
  0x24   :  { %565 = dma.done.wait [#allocation3], 8192  }
  0x25   :  { %566 = vsyncadd [#allocation3], 4294959104 }
  0x26   :  { %567 = dma.done.wait [#allocation6], 4096  }
  0x27   :  { %568 = vsyncadd [#allocation6], 4294963200  ;;  %v577_v0 = vmov 0.0|0.0   ;;  %v104_v1 = vld [vmem:[#allocation5] sm:$0xff]  ;;  %v105_v2 = vld [vmem:[#allocation5 + $0x8] sm:$0xff]  ;;  %s578_s1 = smov [#allocation7]  }
  0x28   :  { %411 = vmatprep.subr.bf16.mxu0 %v577_v0  ;;  %459 = vmatprep.subr.bf16.mxu1 %v577_v0  ;;  %v106_v3 = vld [vmem:[#allocation5 + $0x10] sm:$0xff]  ;;  %v412_v4 = vpack.c.bf16 %v105_v2, %v104_v1  ;;  %v107_v5 = vld [vmem:[#allocation5 + $0x18] sm:$0xff]  ;;  %v108_v7 = vld [vmem:[#allocation5 + $0x20] sm:$0xff]  ;;  %s398_s8 = sshll.u32 %s578_s1, 4  ;;  %s399_s8 = int_to_ptr.vmem [resolvable:$true] %s398_s8 }
  0x29   :  { %v415_v6 = vpack.c.bf16 %v107_v5, %v106_v3  ;;  %v109_v8 = vld [vmem:[#allocation5 + $0x28] sm:$0xff]  ;;  %v110_v10 = vld [vmem:[#allocation5 + $0x30] sm:$0xff]  ;;  %v111_v11 = vld [vmem:[#allocation5 + $0x38] sm:$0xff]  ;;  %s543_s9 = scalar_lea.vmem %s399_s8, 4096  ;;  %p548_p3 = scmp.lt.s32.totalorder %s399_s8, %s399_s8 }
  0x2a   :  { %413 = vmatpush1.bf16.msra.mxu0 %v412_v4  ;;  %475 = vmatpush1.bf16.msra.mxu1 %v412_v4  ;;  %v418_v9 = vpack.c.bf16 %v109_v8, %v108_v7  ;;  %v41_v12 = vld [vmem:[#allocation2 + $0x8] sm:$0xff]  ;;  %v421_v13 = vpack.c.bf16 %v111_v11, %v110_v10  ;;  %v112_v15 = vld [vmem:[#allocation5 + $0x40] sm:$0xff]  ;;  %v114_v18 = vld [vmem:[#allocation5 + $0x50] sm:$0xff]  ;;  %p544_p2 = scmp.ne.s32.totalorder %s399_s8, %s543_s9  ;;  %p549_p4 = scmp.lt.s32.totalorder %s543_s9, %s543_s9 }
  0x2b   :  { %414 = vmatprep.subr.bf16.mxu0 %v577_v0  ;;  %460 = vmatprep.subr.bf16.mxu1 %v577_v0  ;;  %v73_v14 = vld [vmem:[#allocation2 + $0x108] sm:$0xff]  ;;  %v115_v19 = vld [vmem:[#allocation5 + $0x58] sm:$0xff]  ;;  %v116_v21 = vld [vmem:[#allocation5 + $0x60] sm:$0xff] }
  0x2c   :  { %v113_v16 = vld [vmem:[#allocation5 + $0x48] sm:$0xff]  ;;  %200 = vmatprep.mubr.f32.mxu0 %v41_v12  ;;  %280 = vmatprep.mubr.f32.mxu1 %v73_v14  ;;  %v427_v20 = vpack.c.bf16 %v115_v19, %v114_v18  ;;  %v118_v24 = vld [vmem:[#allocation5 + $0x70] sm:$0xff]  ;;  %v119_v25 = vld [vmem:[#allocation5 + $0x78] sm:$0xff]  ;;  %p550_p5 = por %p549_p4, %p548_p3 }
  0x2d   :  { %v424_v17 = vpack.c.bf16 %v113_v16, %v112_v15  ;;  %v117_v22 = vld [vmem:[#allocation5 + $0x68] sm:$0xff]  ;;  %v433_v26 = vpack.c.bf16 %v119_v25, %v118_v24  ;;  %v120_v27 = vld [vmem:[#allocation5 + $0x80] sm:$0xff]  ;;  %v122_v30 = vld [vmem:[#allocation5 + $0x90] sm:$0xff] }
  0x2e   :  { %416 = vmatpush1.bf16.msra.mxu0 %v415_v6  ;;  %476 = vmatpush1.bf16.msra.mxu1 %v415_v6  ;;  %v430_v23 = vpack.c.bf16 %v117_v22, %v116_v21  ;;  %v121_v28 = vld [vmem:[#allocation5 + $0x88] sm:$0xff]  ;;  %v123_v31 = vld [vmem:[#allocation5 + $0x98] sm:$0xff]  ;;  %v124_v33 = vld [vmem:[#allocation5 + $0xa0] sm:$0xff]  ;;  %p551_p6 = pnand %p550_p5, %p544_p2 }
  0x2f   :  { %417 = vmatprep.subr.bf16.mxu0 %v577_v0  ;;  %461 = vmatprep.subr.bf16.mxu1 %v577_v0  ;;  %v436_v29 = vpack.c.bf16 %v121_v28, %v120_v27  ;;  %v439_v32 = vpack.c.bf16 %v123_v31, %v122_v30  ;;  %v125_v34 = vld [vmem:[#allocation5 + $0xa8] sm:$0xff]  ;;  %v126_v36 = vld [vmem:[#allocation5 + $0xb0] sm:$0xff]  ;;  %v127_v37 = vld [vmem:[#allocation5 + $0xb8] sm:$0xff] }
  0x30   :  { %v442_v35 = vpack.c.bf16 %v125_v34, %v124_v33  ;;  %v445_v38 = vpack.c.bf16 %v127_v37, %v126_v36  ;;  %v128_v39 = vld [vmem:[#allocation5 + $0xc0] sm:$0xff]  ;;  %v129_v40 = vld [vmem:[#allocation5 + $0xc8] sm:$0xff]  ;;  %v130_v42 = vld [vmem:[#allocation5 + $0xd0] sm:$0xff] }
  0x31   :  { %v448_v41 = vpack.c.bf16 %v129_v40, %v128_v39  ;;  %v131_v43 = vld [vmem:[#allocation5 + $0xd8] sm:$0xff]  ;;  %v132_v45 = vld [vmem:[#allocation5 + $0xe0] sm:$0xff]  ;;  %v133_v46 = vld [vmem:[#allocation5 + $0xe8] sm:$0xff] }
  0x32   :  { %419 = vmatpush1.bf16.msra.mxu0 %v418_v9  ;;  %477 = vmatpush1.bf16.msra.mxu1 %v418_v9  ;;  %v451_v44 = vpack.c.bf16 %v131_v43, %v130_v42  ;;  %v454_v47 = vpack.c.bf16 %v133_v46, %v132_v45  ;;  %v134_v48 = vld [vmem:[#allocation5 + $0xf0] sm:$0xff]  ;;  %v135_v49 = vld [vmem:[#allocation5 + $0xf8] sm:$0xff]  ;;  %v40_v51 = vld [vmem:[#allocation2] sm:$0xff] }
  0x33   :  { %420 = vmatprep.subr.bf16.mxu0 %v577_v0  ;;  %462 = vmatprep.subr.bf16.mxu1 %v577_v0  ;;  %v457_v50 = vpack.c.bf16 %v135_v49, %v134_v48  ;;  %v72_v52 = vld [vmem:[#allocation2 + $0x100] sm:$0xff]  ;;  %v43_v53 = vld [vmem:[#allocation2 + $0x18] sm:$0xff]  ;;  %v42_v55 = vld [vmem:[#allocation2 + $0x10] sm:$0xff] }
  0x34   :  { %v75_v54 = vld [vmem:[#allocation2 + $0x118] sm:$0xff]  ;;  %v74_v56 = vld [vmem:[#allocation2 + $0x110] sm:$0xff]  ;;  %v45_v57 = vld [vmem:[#allocation2 + $0x28] sm:$0xff] }
  0x35   :  { %v77_v58 = vld [vmem:[#allocation2 + $0x128] sm:$0xff]  ;;  %v44_v59 = vld [vmem:[#allocation2 + $0x20] sm:$0xff]  ;;  %v47_v61 = vld [vmem:[#allocation2 + $0x38] sm:$0xff] }
  0x36   :  { %422 = vmatpush1.bf16.msra.mxu0 %v421_v13  ;;  %478 = vmatpush1.bf16.msra.mxu1 %v421_v13  ;;  %v76_v60 = vld [vmem:[#allocation2 + $0x120] sm:$0xff]  ;;  %v79_v62 = vld [vmem:[#allocation2 + $0x138] sm:$0xff]  ;;  %v46_v63 = vld [vmem:[#allocation2 + $0x30] sm:$0xff] }
  0x37   :  { %423 = vmatprep.subr.bf16.mxu0 %v577_v0  ;;  %463 = vmatprep.subr.bf16.mxu1 %v577_v0  ;;  %v49_v1 = vld [vmem:[#allocation2 + $0x48] sm:$0xff]  ;;  %v48_v3 = vld [vmem:[#allocation2 + $0x40] sm:$0xff]  ;;  %v51_v5 = vld [vmem:[#allocation2 + $0x58] sm:$0xff] }
  0x38   :  { %v81_v2 = vld [vmem:[#allocation2 + $0x148] sm:$0xff]  ;;  %v80_v4 = vld [vmem:[#allocation2 + $0x140] sm:$0xff]  ;;  %v83_v6 = vld [vmem:[#allocation2 + $0x158] sm:$0xff] }
  0x39   :  { %v50_v7 = vld [vmem:[#allocation2 + $0x50] sm:$0xff]  ;;  %v53_v9 = vld [vmem:[#allocation2 + $0x68] sm:$0xff]  ;;  %v52_v11 = vld [vmem:[#allocation2 + $0x60] sm:$0xff] }
  0x3a   :  { %425 = vmatpush1.bf16.msra.mxu0 %v424_v17  ;;  %479 = vmatpush1.bf16.msra.mxu1 %v424_v17  ;;  %v82_v8 = vld [vmem:[#allocation2 + $0x150] sm:$0xff]  ;;  %v85_v10 = vld [vmem:[#allocation2 + $0x168] sm:$0xff]  ;;  %v84_v12 = vld [vmem:[#allocation2 + $0x160] sm:$0xff] }
  0x3b   :  { %426 = vmatprep.subr.bf16.mxu0 %v577_v0  ;;  %464 = vmatprep.subr.bf16.mxu1 %v577_v0  ;;  %v55_v13 = vld [vmem:[#allocation2 + $0x78] sm:$0xff]  ;;  %v54_v15 = vld [vmem:[#allocation2 + $0x70] sm:$0xff]  ;;  %v57_v17 = vld [vmem:[#allocation2 + $0x88] sm:$0xff] }
  0x3c   :  { %v87_v14 = vld [vmem:[#allocation2 + $0x178] sm:$0xff]  ;;  %v86_v16 = vld [vmem:[#allocation2 + $0x170] sm:$0xff]  ;;  %v89_v18 = vld [vmem:[#allocation2 + $0x188] sm:$0xff] }
  0x3d   :  { %v56_v19 = vld [vmem:[#allocation2 + $0x80] sm:$0xff]  ;;  %v59_v21 = vld [vmem:[#allocation2 + $0x98] sm:$0xff]  ;;  %v90_v24 = vld [vmem:[#allocation2 + $0x190] sm:$0xff] }
  0x3e   :  { %428 = vmatpush1.bf16.msra.mxu0 %v427_v20  ;;  %480 = vmatpush1.bf16.msra.mxu1 %v427_v20  ;;  %v88_v20 = vld [vmem:[#allocation2 + $0x180] sm:$0xff]  ;;  %v91_v22 = vld [vmem:[#allocation2 + $0x198] sm:$0xff]  ;;  %v61_v25 = vld [vmem:[#allocation2 + $0xa8] sm:$0xff] }
  0x3f   :  { %429 = vmatprep.subr.bf16.mxu0 %v577_v0  ;;  %465 = vmatprep.subr.bf16.mxu1 %v577_v0  ;;  %v60_v27 = vld [vmem:[#allocation2 + $0xa0] sm:$0xff]  ;;  %v95_v30 = vld [vmem:[#allocation2 + $0x1b8] sm:$0xff]  ;;  %v62_v31 = vld [vmem:[#allocation2 + $0xb0] sm:$0xff] }
  0x40   :  { %v92_v28 = vld [vmem:[#allocation2 + $0x1a0] sm:$0xff]  ;;  %v65_v33 = vld [vmem:[#allocation2 + $0xc8] sm:$0xff]  ;;  %v67_v37 = vld [vmem:[#allocation2 + $0xd8] sm:$0xff] }
  0x41   :  { %v97_v34 = vld [vmem:[#allocation2 + $0x1c8] sm:$0xff]  ;;  %v96_v36 = vld [vmem:[#allocation2 + $0x1c0] sm:$0xff]  ;;  %v66_v39 = vld [vmem:[#allocation2 + $0xd0] sm:$0xff] }
  0x42   :  { %431 = vmatpush1.bf16.msra.mxu0 %v430_v23  ;;  %481 = vmatpush1.bf16.msra.mxu1 %v430_v23  ;;  %v58_v23 = vld [vmem:[#allocation2 + $0x90] sm:$0xff]  ;;  %v101_v42 = vld [vmem:[#allocation2 + $0x1e8] sm:$0xff]  ;;  %v68_v43 = vld [vmem:[#allocation2 + $0xe0] sm:$0xff] }
  0x43   :  { %432 = vmatprep.subr.bf16.mxu0 %v577_v0  ;;  %466 = vmatprep.subr.bf16.mxu1 %v577_v0  ;;  %v98_v40 = vld [vmem:[#allocation2 + $0x1d0] sm:$0xff]  ;;  %v71_v45 = vld [vmem:[#allocation2 + $0xf8] sm:$0xff] }
  0x44   :  { %v103_v46 = vld [vmem:[#allocation2 + $0x1f8] sm:$0xff]  ;;  %v102_v48 = vld [vmem:[#allocation2 + $0x1f0] sm:$0xff] }
  0x46   :  { %434 = vmatpush1.bf16.msra.mxu0 %v433_v26  ;;  %482 = vmatpush1.bf16.msra.mxu1 %v433_v26  ;;  %v93_v26 = vld [vmem:[#allocation2 + $0x1a8] sm:$0xff] }
  0x47   :  { %435 = vmatprep.subr.bf16.mxu0 %v577_v0  ;;  %467 = vmatprep.subr.bf16.mxu1 %v577_v0 }
  0x4a   :  { %437 = vmatpush1.bf16.msra.mxu0 %v436_v29  ;;  %483 = vmatpush1.bf16.msra.mxu1 %v436_v29  ;;  %v63_v29 = vld [vmem:[#allocation2 + $0xb8] sm:$0xff] }
  0x4b   :  { %438 = vmatprep.subr.bf16.mxu0 %v577_v0  ;;  %468 = vmatprep.subr.bf16.mxu1 %v577_v0 }
  0x4e   :  { %440 = vmatpush1.bf16.msra.mxu0 %v439_v32  ;;  %484 = vmatpush1.bf16.msra.mxu1 %v439_v32  ;;  %v94_v32 = vld [vmem:[#allocation2 + $0x1b0] sm:$0xff] }
  0x4f   :  { %441 = vmatprep.subr.bf16.mxu0 %v577_v0  ;;  %469 = vmatprep.subr.bf16.mxu1 %v577_v0 }
  0x52   :  { %443 = vmatpush1.bf16.msra.mxu0 %v442_v35  ;;  %485 = vmatpush1.bf16.msra.mxu1 %v442_v35  ;;  %v64_v35 = vld [vmem:[#allocation2 + $0xc0] sm:$0xff] }
  0x53   :  { %444 = vmatprep.subr.bf16.mxu0 %v577_v0  ;;  %470 = vmatprep.subr.bf16.mxu1 %v577_v0 }
  0x56   :  { %446 = vmatpush1.bf16.msra.mxu0 %v445_v38  ;;  %486 = vmatpush1.bf16.msra.mxu1 %v445_v38  ;;  %v99_v38 = vld [vmem:[#allocation2 + $0x1d8] sm:$0xff] }
  0x57   :  { %447 = vmatprep.subr.bf16.mxu0 %v577_v0  ;;  %471 = vmatprep.subr.bf16.mxu1 %v577_v0 }
  0x5a   :  { %449 = vmatpush1.bf16.msra.mxu0 %v448_v41  ;;  %487 = vmatpush1.bf16.msra.mxu1 %v448_v41  ;;  %v69_v41 = vld [vmem:[#allocation2 + $0xe8] sm:$0xff] }
  0x5b   :  { %450 = vmatprep.subr.bf16.mxu0 %v577_v0  ;;  %472 = vmatprep.subr.bf16.mxu1 %v577_v0 }
  0x5e   :  { %452 = vmatpush1.bf16.msra.mxu0 %v451_v44  ;;  %488 = vmatpush1.bf16.msra.mxu1 %v451_v44  ;;  %v100_v44 = vld [vmem:[#allocation2 + $0x1e0] sm:$0xff] }
  0x5f   :  { %453 = vmatprep.subr.bf16.mxu0 %v577_v0  ;;  %473 = vmatprep.subr.bf16.mxu1 %v577_v0 }
  0x62   :  { %455 = vmatpush1.bf16.msra.mxu0 %v454_v47  ;;  %489 = vmatpush1.bf16.msra.mxu1 %v454_v47  ;;  %v70_v47 = vld [vmem:[#allocation2 + $0xf0] sm:$0xff] }
  0x63   :  { %456 = vmatprep.subr.bf16.mxu0 %v577_v0  ;;  %474 = vmatprep.subr.bf16.mxu1 %v577_v0  ;;  %v78_v0 = vld [vmem:[#allocation2 + $0x130] sm:$0xff] }
  0x66   :  { %458 = vmatpush1.bf16.msra.mxu0 %v457_v50  ;;  %490 = vmatpush1.bf16.msra.mxu1 %v457_v50 }
  0x69   :  { %201 = vmatmul.mubr.f32.vlgmr.msra.gmra.mrb[0].mxu0 %v40_v51  ;;  %281 = vmatmul.mubr.f32.vlgmr.msra.gmra.mrb[0].mxu1 %v72_v52 }
  0x6a   :  { %205 = vmatprep.mubr.f32.mxu0 %v43_v53  ;;  %285 = vmatprep.mubr.f32.mxu1 %v75_v54 }
  0x6d   :  { %206 = vmatmul.mubr.f32.gmra.mrb[2].mxu0 %v42_v55  ;;  %286 = vmatmul.mubr.f32.gmra.mrb[2].mxu1 %v74_v56 }
  0x6e   :  { %210 = vmatprep.mubr.f32.mxu0 %v45_v57  ;;  %290 = vmatprep.mubr.f32.mxu1 %v77_v58 }
  0x71   :  { %211 = vmatmul.mubr.f32.gmra.mrb[4].mxu0 %v44_v59  ;;  %291 = vmatmul.mubr.f32.gmra.mrb[4].mxu1 %v76_v60 }
  0x72   :  { %215 = vmatprep.mubr.f32.mxu0 %v47_v61  ;;  %295 = vmatprep.mubr.f32.mxu1 %v79_v62 }
  0x75   :  { %216 = vmatmul.mubr.f32.gmra.mrb[6].mxu0 %v46_v63  ;;  %296 = vmatmul.mubr.f32.gmra.mrb[6].mxu1 %v78_v0 }
  0x76   :  { %220 = vmatprep.mubr.f32.mxu0 %v49_v1  ;;  %300 = vmatprep.mubr.f32.mxu1 %v81_v2 }
  0x79   :  { %221 = vmatmul.mubr.f32.gmra.mrb[8].mxu0 %v48_v3  ;;  %301 = vmatmul.mubr.f32.gmra.mrb[8].mxu1 %v80_v4 }
  0x7a   :  { %225 = vmatprep.mubr.f32.mxu0 %v51_v5  ;;  %305 = vmatprep.mubr.f32.mxu1 %v83_v6 }
  0x7d   :  { %226 = vmatmul.mubr.f32.gmra.mrb[10].mxu0 %v50_v7  ;;  %306 = vmatmul.mubr.f32.gmra.mrb[10].mxu1 %v82_v8 }
  0x7e   :  { %230 = vmatprep.mubr.f32.mxu0 %v53_v9  ;;  %310 = vmatprep.mubr.f32.mxu1 %v85_v10 }
  0x81   :  { %231 = vmatmul.mubr.f32.gmra.mrb[12].mxu0 %v52_v11  ;;  %311 = vmatmul.mubr.f32.gmra.mrb[12].mxu1 %v84_v12 }
  0x82   :  { %235 = vmatprep.mubr.f32.mxu0 %v55_v13  ;;  %315 = vmatprep.mubr.f32.mxu1 %v87_v14 }
  0x85   :  { %236 = vmatmul.mubr.f32.gmra.mrb[14].mxu0 %v54_v15  ;;  %316 = vmatmul.mubr.f32.gmra.mrb[14].mxu1 %v86_v16 }
  0x86   :  { %240 = vmatprep.mubr.f32.mxu0 %v57_v17  ;;  %320 = vmatprep.mubr.f32.mxu1 %v89_v18 }
  0x89   :  { %241 = vmatmul.mubr.f32.gmra.mrb[16].mxu0 %v56_v19  ;;  %321 = vmatmul.mubr.f32.gmra.mrb[16].mxu1 %v88_v20 }
  0x8a   :  { %245 = vmatprep.mubr.f32.mxu0 %v59_v21  ;;  %325 = vmatprep.mubr.f32.mxu1 %v91_v22 }
  0x8d   :  { %246 = vmatmul.mubr.f32.gmra.mrb[18].mxu0 %v58_v23  ;;  %326 = vmatmul.mubr.f32.gmra.mrb[18].mxu1 %v90_v24 }
  0x8e   :  { %250 = vmatprep.mubr.f32.mxu0 %v61_v25  ;;  %330 = vmatprep.mubr.f32.mxu1 %v93_v26 }
  0x91   :  { %251 = vmatmul.mubr.f32.gmra.mrb[20].mxu0 %v60_v27  ;;  %331 = vmatmul.mubr.f32.gmra.mrb[20].mxu1 %v92_v28 }
  0x92   :  { %255 = vmatprep.mubr.f32.mxu0 %v63_v29  ;;  %335 = vmatprep.mubr.f32.mxu1 %v95_v30 }
  0x95   :  { %256 = vmatmul.mubr.f32.gmra.mrb[22].mxu0 %v62_v31  ;;  %336 = vmatmul.mubr.f32.gmra.mrb[22].mxu1 %v94_v32 }
  0x96   :  { %260 = vmatprep.mubr.f32.mxu0 %v65_v33  ;;  %340 = vmatprep.mubr.f32.mxu1 %v97_v34 }
  0x99   :  { %261 = vmatmul.mubr.f32.gmra.mrb[24].mxu0 %v64_v35  ;;  %341 = vmatmul.mubr.f32.gmra.mrb[24].mxu1 %v96_v36 }
  0x9a   :  { %265 = vmatprep.mubr.f32.mxu0 %v67_v37  ;;  %345 = vmatprep.mubr.f32.mxu1 %v99_v38 }
  0x9d   :  { %266 = vmatmul.mubr.f32.gmra.mrb[26].mxu0 %v66_v39  ;;  %346 = vmatmul.mubr.f32.gmra.mrb[26].mxu1 %v98_v40 }
  0x9e   :  { %270 = vmatprep.mubr.f32.mxu0 %v69_v41  ;;  %350 = vmatprep.mubr.f32.mxu1 %v101_v42 }
  0xa1   :  { %271 = vmatmul.mubr.f32.gmra.mrb[28].mxu0 %v68_v43  ;;  %351 = vmatmul.mubr.f32.gmra.mrb[28].mxu1 %v100_v44 }
  0xa2   :  { %275 = vmatprep.mubr.f32.mxu0 %v71_v45  ;;  %355 = vmatprep.mubr.f32.mxu1 %v103_v46 }
  0xa5   :  { %276 = vmatmul.mubr.f32.gmra.mrb[30].mxu0 %v70_v47  ;;  %356 = vmatmul.mubr.f32.gmra.mrb[30].mxu1 %v102_v48 }
 0x13c   :  { %v202_v49 = vpop.f32.mrb[0].mxu0  ;;  %v282_v50 = vpop.f32.mrb[0].mxu1 }
 0x13d   :  { %361 = vst [vmem:[#allocation7] sm:$0xff] %v202_v49  ;;  %377 = vst [vmem:[#allocation7 + $0x80] sm:$0xff] %v282_v50  ;;  %v204_v51 = vpop.f32.mrb[1].mxu0  ;;  %v284_v52 = vpop.f32.mrb[1].mxu1 }
 0x140   :  { %v207_v53 = vpop.f32.mrb[2].mxu0  ;;  %v287_v54 = vpop.f32.mrb[2].mxu1 }
 0x141   :  { %362 = vst [vmem:[#allocation7 + $0x8] sm:$0xff] %v207_v53  ;;  %378 = vst [vmem:[#allocation7 + $0x88] sm:$0xff] %v287_v54  ;;  %v209_v55 = vpop.f32.mrb[3].mxu0  ;;  %v289_v56 = vpop.f32.mrb[3].mxu1 }
 0x144   :  { %v212_v57 = vpop.f32.mrb[4].mxu0  ;;  %v292_v58 = vpop.f32.mrb[4].mxu1 }
 0x145   :  { %363 = vst [vmem:[#allocation7 + $0x10] sm:$0xff] %v212_v57  ;;  %379 = vst [vmem:[#allocation7 + $0x90] sm:$0xff] %v292_v58  ;;  %v214_v59 = vpop.f32.mrb[5].mxu0  ;;  %v294_v60 = vpop.f32.mrb[5].mxu1 }
 0x148   :  { %v217_v61 = vpop.f32.mrb[6].mxu0  ;;  %v297_v62 = vpop.f32.mrb[6].mxu1 }
 0x149   :  { %364 = vst [vmem:[#allocation7 + $0x18] sm:$0xff] %v217_v61  ;;  %380 = vst [vmem:[#allocation7 + $0x98] sm:$0xff] %v297_v62  ;;  %v219_v63 = vpop.f32.mrb[7].mxu0  ;;  %v299_v0 = vpop.f32.mrb[7].mxu1 }
 0x14c   :  { %v222_v1 = vpop.f32.mrb[8].mxu0  ;;  %v302_v2 = vpop.f32.mrb[8].mxu1 }
 0x14d   :  { %365 = vst [vmem:[#allocation7 + $0x20] sm:$0xff] %v222_v1  ;;  %381 = vst [vmem:[#allocation7 + $0xa0] sm:$0xff] %v302_v2  ;;  %v224_v3 = vpop.f32.mrb[9].mxu0  ;;  %v304_v4 = vpop.f32.mrb[9].mxu1 }
 0x150   :  { %v227_v5 = vpop.f32.mrb[10].mxu0  ;;  %v307_v6 = vpop.f32.mrb[10].mxu1 }
 0x151   :  { %366 = vst [vmem:[#allocation7 + $0x28] sm:$0xff] %v227_v5  ;;  %382 = vst [vmem:[#allocation7 + $0xa8] sm:$0xff] %v307_v6  ;;  %v229_v7 = vpop.f32.mrb[11].mxu0  ;;  %v309_v8 = vpop.f32.mrb[11].mxu1 }
 0x154   :  { %v232_v9 = vpop.f32.mrb[12].mxu0  ;;  %v312_v10 = vpop.f32.mrb[12].mxu1 }
 0x155   :  { %367 = vst [vmem:[#allocation7 + $0x30] sm:$0xff] %v232_v9  ;;  %383 = vst [vmem:[#allocation7 + $0xb0] sm:$0xff] %v312_v10  ;;  %v234_v11 = vpop.f32.mrb[13].mxu0  ;;  %v314_v12 = vpop.f32.mrb[13].mxu1 }
 0x158   :  { %v237_v13 = vpop.f32.mrb[14].mxu0  ;;  %v317_v14 = vpop.f32.mrb[14].mxu1 }
 0x159   :  { %368 = vst [vmem:[#allocation7 + $0x38] sm:$0xff] %v237_v13  ;;  %384 = vst [vmem:[#allocation7 + $0xb8] sm:$0xff] %v317_v14  ;;  %v239_v15 = vpop.f32.mrb[15].mxu0  ;;  %v319_v16 = vpop.f32.mrb[15].mxu1 }
 0x15c   :  { %v242_v17 = vpop.f32.mrb[16].mxu0  ;;  %v322_v18 = vpop.f32.mrb[16].mxu1 }
 0x15d   :  { %369 = vst [vmem:[#allocation7 + $0x40] sm:$0xff] %v242_v17  ;;  %385 = vst [vmem:[#allocation7 + $0xc0] sm:$0xff] %v322_v18  ;;  %v244_v19 = vpop.f32.mrb[17].mxu0  ;;  %v324_v20 = vpop.f32.mrb[17].mxu1 }
 0x160   :  { %v247_v21 = vpop.f32.mrb[18].mxu0  ;;  %v327_v22 = vpop.f32.mrb[18].mxu1 }
 0x161   :  { %370 = vst [vmem:[#allocation7 + $0x48] sm:$0xff] %v247_v21  ;;  %386 = vst [vmem:[#allocation7 + $0xc8] sm:$0xff] %v327_v22  ;;  %v249_v23 = vpop.f32.mrb[19].mxu0  ;;  %v329_v24 = vpop.f32.mrb[19].mxu1 }
 0x164   :  { %v252_v25 = vpop.f32.mrb[20].mxu0  ;;  %v332_v26 = vpop.f32.mrb[20].mxu1 }
 0x165   :  { %371 = vst [vmem:[#allocation7 + $0x50] sm:$0xff] %v252_v25  ;;  %387 = vst [vmem:[#allocation7 + $0xd0] sm:$0xff] %v332_v26  ;;  %v254_v27 = vpop.f32.mrb[21].mxu0  ;;  %v334_v28 = vpop.f32.mrb[21].mxu1 }
 0x168   :  { %v257_v29 = vpop.f32.mrb[22].mxu0  ;;  %v337_v30 = vpop.f32.mrb[22].mxu1 }
 0x169   :  { %372 = vst [vmem:[#allocation7 + $0x58] sm:$0xff] %v257_v29  ;;  %388 = vst [vmem:[#allocation7 + $0xd8] sm:$0xff] %v337_v30  ;;  %v259_v31 = vpop.f32.mrb[23].mxu0  ;;  %v339_v32 = vpop.f32.mrb[23].mxu1 }
 0x16c   :  { %v262_v33 = vpop.f32.mrb[24].mxu0  ;;  %v342_v34 = vpop.f32.mrb[24].mxu1 }
 0x16d   :  { %373 = vst [vmem:[#allocation7 + $0x60] sm:$0xff] %v262_v33  ;;  %389 = vst [vmem:[#allocation7 + $0xe0] sm:$0xff] %v342_v34  ;;  %v264_v35 = vpop.f32.mrb[25].mxu0  ;;  %v344_v36 = vpop.f32.mrb[25].mxu1 }
 0x170   :  { %v267_v37 = vpop.f32.mrb[26].mxu0  ;;  %v347_v38 = vpop.f32.mrb[26].mxu1 }
 0x171   :  { %374 = vst [vmem:[#allocation7 + $0x68] sm:$0xff] %v267_v37  ;;  %390 = vst [vmem:[#allocation7 + $0xe8] sm:$0xff] %v347_v38  ;;  %v269_v39 = vpop.f32.mrb[27].mxu0  ;;  %v349_v40 = vpop.f32.mrb[27].mxu1 }
 0x174   :  { %v272_v41 = vpop.f32.mrb[28].mxu0  ;;  %v352_v42 = vpop.f32.mrb[28].mxu1 }
 0x175   :  { %375 = vst [vmem:[#allocation7 + $0x70] sm:$0xff] %v272_v41  ;;  %391 = vst [vmem:[#allocation7 + $0xf0] sm:$0xff] %v352_v42  ;;  %v274_v43 = vpop.f32.mrb[29].mxu0  ;;  %v354_v44 = vpop.f32.mrb[29].mxu1 }
 0x178   :  { %v277_v45 = vpop.f32.mrb[30].mxu0  ;;  %v357_v46 = vpop.f32.mrb[30].mxu1 }
 0x179   :  { %376 = vst [vmem:[#allocation7 + $0x78] sm:$0xff] %v277_v45  ;;  %392 = vst [vmem:[#allocation7 + $0xf8] sm:$0xff] %v357_v46  ;;  %v279_v47 = vpop.f32.mrb[31].mxu0  ;;  %v359_v48 = vpop.f32.mrb[31].mxu1 }
 0x17a   :  { %554 = shalt.err (!%p551_p6)
}
 0x17b   :  { %s555_s12 = scalar_lea.hbm %s670_s2, 4096 }
 0x17c   :  { %p556_p7 = scmp.ne.s32.totalorder %s670_s2, %s555_s12  ;;  %p559_p8 = scmp.lt.u32.totalorder %s555_s12, %s670_s2 }
 0x17e   :  { %p561_p9 = pnand %p559_p8, %p556_p7 }
 0x180   :  { %564 = shalt.err (!%p561_p9)
}
 0x181   :  { %404 = dma.vmem_to_hbm [thread:$0]  %s399_s8, 4096, %s670_s2, [#allocation4], %s575_s0, %s575_s0, %s576_s5  }
 0x182   :  { %569 = dma.done.wait [#allocation4], 4096  }
 0x183   :  { %570 = vsyncadd [#allocation4], 4294963200 }
 0x184   :  { %408 = vsyncpa [#allocation3], 1 }
 0x185   :  { %409 = vsyncpa [#allocation6], 1 }
 0x186   :  { %410 = vsyncpa [#allocation4], 1 }

</bundles_post_ra>
